<compile_context>
chip_gen: v7x
topology: tpu7x:2x2x1
jax: 0.10.0
libtpu: 0.0.40
codegen_flags: <defaults>
</compile_context>

<pallas_src>
import functools

import jax
import jax.numpy as jnp
from jax.experimental import pallas as pl
from jax.experimental.pallas import tpu as pltpu

LANE = 128      # vreg lane width (last dim)
SUBLANE = 8     # vreg sublane width (second-to-last dim)


def _round_up(x, m):
    return (x + m - 1) // m * m


def _mlp_kernel(x_ref, w1_ref, b1_ref, w2_ref, b2_ref, o_ref):
    # Hidden layer: (Bt, S) @ (S, Hp) + (1, Hp), then ReLU.  Hp is lane-dense
    # (128) so the bias add / ReLU are full, unmasked vreg ops.
    h = jnp.dot(x_ref[...], w1_ref[...], preferred_element_type=jnp.float32)
    h = jnp.maximum(h + b1_ref[...], 0.0)
    # Output layer: (Bt, Hp) @ (Hp, A) + (1, A).  A is tiny (masked vst);
    # vector-store slots have huge slack here, HBM bytes are what matter.
    out = jnp.dot(h, w2_ref[...], preferred_element_type=jnp.float32)
    o_ref[...] = (out + b2_ref[...]).astype(o_ref.dtype)


def prepare_params(w1, b1, w2, b2):
    """Pad the hidden dim of the weights / biases to the 128-lane vreg width.

    Call ONCE per parameter set (not per forward call).  Zero padding is
    numerically inert: padded hidden columns are relu(0 + 0) = 0 and the
    corresponding w2 rows are 0, so they contribute nothing to the logits."""
    S, H = w1.shape
    A = w2.shape[1]
    H_p = _round_up(H, LANE)
    w1_p = jnp.zeros((S, H_p), jnp.float32).at[:, :H].set(w1.astype(jnp.float32))
    b1_p = jnp.zeros((1, H_p), jnp.float32).at[:, :H].set(
        jnp.reshape(b1, (1, H)).astype(jnp.float32))
    w2_p = jnp.zeros((H_p, A), jnp.float32).at[:H, :].set(w2.astype(jnp.float32))
    b2_p = jnp.reshape(b2, (1, A)).astype(jnp.float32)
    return w1_p, b1_p, w2_p, b2_p


@functools.partial(jax.jit, static_argnames=("block_b",))
def mlp_forward(x, w1_p, b1_p, w2_p, b2_p, *, block_b=8192):
    """x: (B, state_size); padded params from prepare_params().
    Returns (B, action_size) == relu(x @ w1 + b1) @ w2 + b2."""
    B, S = x.shape
    H_p = w1_p.shape[1]
    A = w2_p.shape[1]

    # Pad batch only to the sublane granule (no-op when B % 8 == 0).
    B_p = _round_up(B, SUBLANE)
    x_in = x.astype(jnp.float32)
    if B_p != B:
        x_in = jnp.pad(x_in, ((0, B_p - B), (0, 0)))

    # Batch tile: whole batch if small, else big tiles (amortize the ~0.35 us
    # per-grid-step overhead).  For large batches keep >= 2 grid steps so the
    # "parallel" axis can be sharded across both v7x TensorCores.
    tile_b = min(B_p, block_b)
    if B_p >= 4096:
        tile_b = min(tile_b, _round_up(pl.cdiv(B_p, 2), SUBLANE))
    grid = (pl.cdiv(B_p, tile_b),)   # ragged tail blocks are masked by Pallas

    # Accurate (un-inflated) advisory cost: these are the bytes actually moved.
    flops = 2 * B_p * (S * H_p + H_p * A)
    bytes_accessed = 4 * (B_p * S + S * H_p + H_p + H_p * A + A + B_p * A)

    out = pl.pallas_call(
        _mlp_kernel,
        out_shape=jax.ShapeDtypeStruct((B_p, A), jnp.float32),
        grid=grid,
        in_specs=[
            # Activations: tiled over batch; last block dim == full array dim
            # (exempt from the 128-lane rule) so no feature padding in HBM.
            pl.BlockSpec((tile_b, S), lambda i: (i, 0)),
            # Weights / biases: same block every step -> resident in VMEM,
            # DMA'd once across the whole grid.
            pl.BlockSpec((S, H_p), lambda i: (0, 0)),
            pl.BlockSpec((1, H_p), lambda i: (0, 0)),
            pl.BlockSpec((H_p, A), lambda i: (0, 0)),
            pl.BlockSpec((1, A), lambda i: (0, 0)),
        ],
        out_specs=pl.BlockSpec((tile_b, A), lambda i: (i, 0)),
        compiler_params=pltpu.CompilerParams(
            dimension_semantics=("parallel",),     # shard batch across TCs
            # Narrow (S=4 / A=2 lane) blocks are lane-padded in VMEM storage
            # (~512 B/row each) even though HBM traffic is dense, so raise the
            # scoped VMEM cap above v5e's 16 MiB default for the 8K-row tile.
            vmem_limit_bytes=48 * 1024 * 1024),
        cost_estimate=pl.CostEstimate(
            flops=flops, bytes_accessed=bytes_accessed, transcendentals=0),
    )(x_in, w1_p, b1_p, w2_p, b2_p)

    return out if B_p == B else out[:B]


def init_params(key, state_size, action_size, hidden_layer):
    """Deterministic PyTorch-style (uniform +/- 1/sqrt(fan_in)) init.

    Weights are stored already transposed to (in_features, out_features)
    so the kernel does x @ W directly (equivalent to PyTorch's x @ W.T)."""
    k1, k2, k3, k4 = jax.random.split(key, 4)
    bound1 = 1.0 / jnp.sqrt(jnp.float32(state_size))
    bound2 = 1.0 / jnp.sqrt(jnp.float32(hidden_layer))
    w1 = jax.random.uniform(k1, (state_size, hidden_layer), jnp.float32,
                            -bound1, bound1)
    b1 = jax.random.uniform(k2, (1, hidden_layer), jnp.float32,
                            -bound1, bound1)
    w2 = jax.random.uniform(k3, (hidden_layer, action_size), jnp.float32,
                            -bound2, bound2)
    b2 = jax.random.uniform(k4, (1, action_size), jnp.float32,
                            -bound2, bound2)
    return w1, b1, w2, b2


def reference_forward(x, w1, b1, w2, b2):
    h = jnp.maximum(x @ w1 + b1, 0.0)
    return h @ w2 + b2


if __name__ == "__main__":
    # CartPole-like sizes, kept small: state=4, actions=2, hidden=32, batch=8.
    state_size, action_size, hidden_layer = 4, 2, 32
    batch = 8

    key = jax.random.PRNGKey(0)
    k_x, k_p = jax.random.split(key)
    x = jax.random.normal(k_x, (batch, state_size), jnp.float32)
    w1, b1, w2, b2 = init_params(k_p, state_size, action_size, hidden_layer)

    # One-time parameter preparation (outside the per-call hot path).
    params_p = prepare_params(w1, b1, w2, b2)

    out = mlp_forward(x, *params_p)
    jax.block_until_ready(out)

    ref = reference_forward(x, w1, b1, w2, b2)
    assert out.shape == (batch, action_size)
    assert jnp.allclose(out, ref, atol=1e-5, rtol=1e-5)

    # Also exercise the batched path: non-multiple-of-8 batch, >= 2 grid steps
    # (tile split for the parallel axis) and a ragged tail block.
    big_batch = 8192 + 7
    xb = jax.random.normal(jax.random.PRNGKey(1), (big_batch, state_size),
                           jnp.float32)
    out_b = mlp_forward(xb, *params_p)
    jax.block_until_ready(out_b)
    assert out_b.shape == (big_batch, action_size)
    assert jnp.allclose(out_b, reference_forward(xb, w1, b1, w2, b2),
                        atol=1e-5, rtol=1e-5)

    print("KERNEL_OK")
</pallas_src>

<mosaic_0001>
module attributes {stable_mosaic.version = 11 : i64} {
  func.func @_mlp_kernel(%arg0: i32, %arg1: memref<8x4xf32, #tpu.memory_space<vmem>>, %arg2: memref<4x128xf32, #tpu.memory_space<vmem>>, %arg3: memref<1x128xf32, #tpu.memory_space<vmem>>, %arg4: memref<128x2xf32, #tpu.memory_space<vmem>>, %arg5: memref<1x2xf32, #tpu.memory_space<vmem>>, %arg6: memref<8x2xf32, #tpu.memory_space<vmem>>) attributes {dimension_semantics = [#tpu.dimension_semantics<parallel>], iteration_bounds = array<i64: 1>, scalar_prefetch = 0 : i64, scratch_operands = 0 : i64, tpu.core_type = #tpu.core_type<tc>, window_params = [{transform_indices = @transform_0, window_bounds = array<i64: 8, 4>}, {pipeline_mode = #tpu.pipeline_mode<synchronous>, transform_indices = @transform_1, window_bounds = array<i64: 4, 128>}, {pipeline_mode = #tpu.pipeline_mode<synchronous>, transform_indices = @transform_2, window_bounds = array<i64: 1, 128>}, {pipeline_mode = #tpu.pipeline_mode<synchronous>, transform_indices = @transform_3, window_bounds = array<i64: 128, 2>}, {pipeline_mode = #tpu.pipeline_mode<synchronous>, transform_indices = @transform_4, window_bounds = array<i64: 1, 2>}, {transform_indices = @transform_5, window_bounds = array<i64: 8, 2>}]} {
    %c0 = arith.constant 0 : index
    %c0_0 = arith.constant 0 : index
    %0 = vector.load %arg1[%c0, %c0_0] : memref<8x4xf32, #tpu.memory_space<vmem>>, vector<8x4xf32>
    %c0_1 = arith.constant 0 : index
    %c0_2 = arith.constant 0 : index
    %1 = vector.load %arg2[%c0_1, %c0_2] : memref<4x128xf32, #tpu.memory_space<vmem>>, vector<4x128xf32>
    %cst = arith.constant dense<0.000000e+00> : vector<8x128xf32>
    %2 = tpu.matmul %0, %1, %cst {dimension_numbers = #tpu.dot_dimension_numbers<[1], [0], [0], [1], [0, 0, 1, 1], [], []>} : vector<8x4xf32>, vector<4x128xf32>, vector<8x128xf32> -> vector<8x128xf32>
    %c0_3 = arith.constant 0 : index
    %c0_4 = arith.constant 0 : index
    %3 = vector.load %arg3[%c0_3, %c0_4] : memref<1x128xf32, #tpu.memory_space<vmem>>, vector<1x128xf32>
    %4 = vector.broadcast %3 : vector<1x128xf32> to vector<8x128xf32>
    %5 = arith.addf %2, %4 : vector<8x128xf32>
    %cst_5 = arith.constant 0.000000e+00 : f32
    %6 = vector.broadcast %cst_5 : f32 to vector<8x128xf32>
    %7 = arith.maximumf %5, %6 : vector<8x128xf32>
    %c0_6 = arith.constant 0 : index
    %c0_7 = arith.constant 0 : index
    %8 = vector.load %arg4[%c0_6, %c0_7] : memref<128x2xf32, #tpu.memory_space<vmem>>, vector<128x2xf32>
    %cst_8 = arith.constant dense<0.000000e+00> : vector<8x2xf32>
    %9 = tpu.matmul %7, %8, %cst_8 {dimension_numbers = #tpu.dot_dimension_numbers<[1], [0], [0], [1], [0, 0, 1, 1], [], []>} : vector<8x128xf32>, vector<128x2xf32>, vector<8x2xf32> -> vector<8x2xf32>
    %c0_9 = arith.constant 0 : index
    %c0_10 = arith.constant 0 : index
    %10 = vector.load %arg5[%c0_9, %c0_10] : memref<1x2xf32, #tpu.memory_space<vmem>>, vector<1x2xf32>
    %11 = vector.broadcast %10 : vector<1x2xf32> to vector<8x2xf32>
    %12 = arith.addf %9, %11 : vector<8x2xf32>
    %c0_11 = arith.constant 0 : index
    %c0_12 = arith.constant 0 : index
    %13 = vector.load %arg6[%c0_11, %c0_12] : memref<8x2xf32, #tpu.memory_space<vmem>>, vector<8x2xf32>
    tpu.vector_store %arg6[%c0_11, %c0_12], %12 {strides = array<i32>} : memref<8x2xf32, #tpu.memory_space<vmem>>, vector<8x2xf32>,
    return
  }
  func.func @transform_0(%arg0: i32) -> (i32, i32) {
    %c0_i32 = arith.constant 0 : i32
    %c0_i32_0 = arith.constant 0 : i32
    return %arg0, %c0_i32 : i32, i32
  }
  func.func @transform_1(%arg0: i32) -> (i32, i32) {
    %c0_i32 = arith.constant 0 : i32
    %c0_i32_0 = arith.constant 0 : i32
    %c0_i32_1 = arith.constant 0 : i32
    return %c0_i32, %c0_i32_0 : i32, i32
  }
  func.func @transform_2(%arg0: i32) -> (i32, i32) {
    %c0_i32 = arith.constant 0 : i32
    %c0_i32_0 = arith.constant 0 : i32
    %c0_i32_1 = arith.constant 0 : i32
    return %c0_i32, %c0_i32_0 : i32, i32
  }
  func.func @transform_3(%arg0: i32) -> (i32, i32) {
    %c0_i32 = arith.constant 0 : i32
    %c0_i32_0 = arith.constant 0 : i32
    %c0_i32_1 = arith.constant 0 : i32
    return %c0_i32, %c0_i32_0 : i32, i32
  }
  func.func @transform_4(%arg0: i32) -> (i32, i32) {
    %c0_i32 = arith.constant 0 : i32
    %c0_i32_0 = arith.constant 0 : i32
    %c0_i32_1 = arith.constant 0 : i32
    return %c0_i32, %c0_i32_0 : i32, i32
  }
  func.func @transform_5(%arg0: i32) -> (i32, i32) {
    %c0_i32 = arith.constant 0 : i32
    %c0_i32_0 = arith.constant 0 : i32
    return %arg0, %c0_i32 : i32, i32
  }
}

</mosaic_0001>

<bundles_post_ra>
// kernel: mlp_forward.1
= control target key start
LH: loop header
LB: loop body
LE: loop exit
PB: predicated region body
PF: predicated region fallthrough
CT: control target
= control target key end

     0   :  { %vm33_vm0 = vcmask 1043456   ;;  %vm29_vm1 = vcmask 31744   ;;  %v297_v0 = vmov 0.0   ;;  %vm298_vm2 = vmmov 0   ;;  %s393_s1 = inlined_call_operand.vmem [shape: f32[4,128], index: 1, kind: input, shape index: {}]   ;;  %s394_s0 = inlined_call_operand.vmem [shape: f32[8,4], index: 0, kind: input, shape index: {}]   ;;  %s395_s3 = inlined_call_operand.vmem [shape: f32[128,2], index: 3, kind: input, shape index: {}]   ;;  %s396_s2 = inlined_call_operand.vmem [shape: f32[1,128], index: 2, kind: input, shape index: {}]   ;;  %s397_s4 = inlined_call_operand.vmem [shape: f32[1,2], index: 4, kind: input, shape index: {}]   ;;  %s398_s5 = inlined_call_operand.vmem [shape: f32[8,2], index: 5, kind: output, shape index: {}]  }
   0x1   :  { %230 = vmatprep.subr.mxu0 %v297_v0  ;;  %v21_v1 = vld [vmem:[%s393_s1] sm:$0xf]  ;;  %232 = vmatprep.mubr.msk.f32.mxu0 %vm298_vm2, %v297_v0  ;;  %v299_v4 = vmov 0.0|0.0   ;;  %v109_v5 = vld [vmem:[%s395_s3 + $0x8] sm:$0xff]  ;;  %v110_v6 = vld [vmem:[%s395_s3 + $0x10] sm:$0xff]  ;;  %vm201_vm3 = vcmask 15360  }
   0x2   :  { %v20_v2 = vld [vmem:[%s394_s0] sm:$0xff]  ;;  %231 = vmatpush3.msk.msra.mxu0 %vm33_vm0, %v21_v1  ;;  %270 = vmatprep.subr.bf16.mxu1 %v299_v4  ;;  %v111_v7 = vld [vmem:[%s395_s3 + $0x18] sm:$0xff]  ;;  %v113_v11 = vld [vmem:[%s395_s3 + $0x28] sm:$0xff] }
   0x3   :  { %v108_v3 = vld [vmem:[%s395_s3] sm:$0xff]  ;;  %233 = vmatmul.mubr.msk.f32.vlgmr.msra.gmra.mrb[0].mxu0 %vm29_vm1, %v20_v2  ;;  %267 = vmatprep.mubr.msk.f32.mxu1 %vm298_vm2, %v297_v0  ;;  %v274_v9 = vpack.c.bf16 %v111_v7, %v110_v6  ;;  %v114_v13 = vld [vmem:[%s395_s3 + $0x30] sm:$0xff]  ;;  %v115_v14 = vld [vmem:[%s395_s3 + $0x38] sm:$0xff] }
   0x4   :  { %v271_v8 = vpack.c.bf16 %v109_v5, %v108_v3  ;;  %v112_v10 = vld [vmem:[%s395_s3 + $0x20] sm:$0xff]  ;;  %v280_v15 = vpack.c.bf16 %v115_v14, %v114_v13  ;;  %v117_v17 = vld [vmem:[%s395_s3 + $0x48] sm:$0xff]  ;;  %v118_v19 = vld [vmem:[%s395_s3 + $0x50] sm:$0xff] }
   0x5   :  { %v277_v12 = vpack.c.bf16 %v113_v11, %v112_v10  ;;  %v116_v16 = vld [vmem:[%s395_s3 + $0x40] sm:$0xff]  ;;  %v119_v20 = vld [vmem:[%s395_s3 + $0x58] sm:$0xff]  ;;  %v121_v23 = vld [vmem:[%s395_s3 + $0x68] sm:$0xff] }
   0x6   :  { %272 = vmatpush3.bf16.msra.mxu1 %v271_v8  ;;  %v283_v18 = vpack.c.bf16 %v117_v17, %v116_v16  ;;  %v286_v21 = vpack.c.bf16 %v119_v20, %v118_v19  ;;  %v120_v22 = vld [vmem:[%s395_s3 + $0x60] sm:$0xff]  ;;  %v122_v25 = vld [vmem:[%s395_s3 + $0x70] sm:$0xff]  ;;  %v123_v26 = vld [vmem:[%s395_s3 + $0x78] sm:$0xff] }
   0x7   :  { %273 = vmatprep.subr.bf16.mxu1 %v299_v4  ;;  %v289_v24 = vpack.c.bf16 %v121_v23, %v120_v22  ;;  %v292_v27 = vpack.c.bf16 %v123_v26, %v122_v25  ;;  %v207_v28 = vld [vmem:[%s396_s2] ss:$0 sm:$0xff] }
   0x8   :  { %v210_v33 = vld [vmem:[%s397_s4] ss:$0 sm:$0xff] }
   0xa   :  { %275 = vmatpush3.bf16.msra.mxu1 %v274_v9 }
   0xb   :  { %276 = vmatprep.subr.bf16.mxu1 %v299_v4 }
   0xe   :  { %278 = vmatpush3.bf16.msra.mxu1 %v277_v12 }
   0xf   :  { %279 = vmatprep.subr.bf16.mxu1 %v299_v4 }
  0x12   :  { %281 = vmatpush3.bf16.msra.mxu1 %v280_v15 }
  0x13   :  { %282 = vmatprep.subr.bf16.mxu1 %v299_v4 }
  0x16   :  { %284 = vmatpush3.bf16.msra.mxu1 %v283_v18 }
  0x17   :  { %285 = vmatprep.subr.bf16.mxu1 %v299_v4 }
  0x1a   :  { %287 = vmatpush3.bf16.msra.mxu1 %v286_v21 }
  0x1b   :  { %288 = vmatprep.subr.bf16.mxu1 %v299_v4 }
  0x1e   :  { %290 = vmatpush3.bf16.msra.mxu1 %v289_v24 }
  0x1f   :  { %291 = vmatprep.subr.bf16.mxu1 %v299_v4 }
  0x22   :  { %293 = vmatpush3.bf16.msra.mxu1 %v292_v27 }
  0xd6   :  { %v103_v29 = vpop.f32.mrb[0].mxu0 }
  0xd7   :  { %v104_v30 = vadd.f32 %v207_v28, %v103_v29  ;;  %v234_v31 = vpop.f32.mrb[1].mxu0 }
  0xd9   :  { %v107_v32 = vmax.f32 %v104_v30, 0.0 }
  0xdb   :  { %268 = vmatmul.mubr.f32.vlgmr.msra.gmra.mrb[0].mxu1 %v107_v32 }
 0x1ae   :  { %v197_v34 = vpop.f32.mrb[0].mxu1 }
 0x1af   :  { %v198_v35 = vadd.f32 %v210_v33, %v197_v34  ;;  %v269_v36 = vpop.f32.mrb[1].mxu1 }
 0x1b1   :  { %202 = vst.msk [vmem:[%s398_s5] sm:$0xff] %vm201_vm3, %v198_v35 }

</bundles_post_ra>
